<compile_context>
chip_gen: v5e
topology: v5e:2x2
jax: 0.10.0
libtpu: 0.0.40
codegen_flags: <defaults>
</compile_context>

<pallas_src>
import functools

import jax
import jax.numpy as jnp
from jax.experimental import pallas as pl
from jax.experimental.pallas import tpu as pltpu

HIDDEN1 = 128        # first hidden width (lane-aligned already)
HIDDEN2 = 64         # second hidden width (real)
HIDDEN2_PAD = 128    # second hidden width padded to a full lane width


def _round_up(v, m):
    return (v + m - 1) // m * m


def surface_mlp_kernel(x_ref, w1_ref, b1_ref, w2_ref, b2_ref, w3_ref, b3_ref,
                       o_ref, *, compute_dtype):
    """Fused 3-layer MLP on one batch tile.

    x_ref : [TM, input_dim]        (any float dtype; cast on load if needed)
    w1_ref: [input_dim, 128]       b1_ref: [1, 128]  (f32)
    w2_ref: [128, 128]             b2_ref: [1, 128]  (f32; cols 64..127 zero pad)
    w3_ref: [1, 128]   (f32 row; cols 64..127 zero pad)
    b3_ref: [1, 1]     (f32)
    o_ref : [TM, 1]    (f32)
    """
    x = x_ref[...].astype(compute_dtype)   # no-op when x already in compute dtype

    h1 = jnp.dot(x, w1_ref[...], preferred_element_type=jnp.float32)
    h1 = jnp.maximum(h1 + b1_ref[...], 0.0)

    h2 = jnp.dot(h1.astype(compute_dtype), w2_ref[...],
                 preferred_element_type=jnp.float32)
    h2 = jnp.maximum(h2 + b2_ref[...], 0.0)

    # Layer 3 (64 -> 1): VPU multiply by the padded w3 row + XLU lane reduction.
    # Produces the narrow [TM, 1] output tile directly (no padded MXU pass).
    o = jnp.sum(h2 * w3_ref[...], axis=-1, keepdims=True) + b3_ref[...]

    o_ref[...] = o.astype(o_ref.dtype)


def init_surface_params(key, input_dim, dtype=jnp.float32):
    """PyTorch nn.Linear default init (U(+/- 1/sqrt(fan_in))), PyTorch [out, in] layout."""
    def linear(k, fan_in, fan_out):
        kw, kb = jax.random.split(k)
        lim = 1.0 / (fan_in ** 0.5)
        w = jax.random.uniform(kw, (fan_out, fan_in), dtype, minval=-lim, maxval=lim)
        b = jax.random.uniform(kb, (fan_out,), dtype, minval=-lim, maxval=lim)
        return w, b

    k1, k2, k3 = jax.random.split(key, 3)
    w1, b1 = linear(k1, input_dim, HIDDEN1)
    w2, b2 = linear(k2, HIDDEN1, HIDDEN2)
    w3, b3 = linear(k3, HIDDEN2, 1)
    return (w1, b1, w2, b2, w3, b3)


def pack_params(params, dtype=jnp.float32):
    """One-time packing (outside the hot path): transpose to [in, out], zero-pad.

    `dtype` is the MXU-operand dtype for the two big weight matrices (use bf16 on
    v5e/v6e/v7x for bandwidth/throughput). Biases and the tiny layer-3 row stay
    f32 because they feed the f32 accumulators / VPU path.
    """
    w1, b1, w2, b2, w3, b3 = params
    w1p = jnp.asarray(w1, dtype).T                                        # [in, 128]
    b1p = jnp.asarray(b1, jnp.float32).reshape(1, HIDDEN1)                # [1, 128]
    w2p = jnp.zeros((HIDDEN1, HIDDEN2_PAD), dtype).at[:, :HIDDEN2].set(
        jnp.asarray(w2, dtype).T)                                         # [128, 128]
    b2p = jnp.zeros((1, HIDDEN2_PAD), jnp.float32).at[0, :HIDDEN2].set(
        jnp.asarray(b2, jnp.float32))                                     # [1, 128]
    w3p = jnp.zeros((1, HIDDEN2_PAD), jnp.float32).at[0, :HIDDEN2].set(
        jnp.asarray(w3, jnp.float32).reshape(-1))                         # [1, 128]
    b3p = jnp.asarray(b3, jnp.float32).reshape(1, 1)                      # [1, 1]
    return (w1p, b1p, w2p, b2p, w3p, b3p)


def _choose_tm(batch, input_dim, x_itemsize):
    """Batch tile: big enough to amortize per-step cost, small enough for v7x VMEM."""
    # Per-row VMEM per grid step: double-buffered x/out tiles + f32 h1/h2
    # intermediates (spill to VMEM scratch at large TM) + cast copy of x.
    per_row = 3 * input_dim * x_itemsize + 2 * 4 + 2 * HIDDEN1 * 4
    budget = 16 * 1024 * 1024          # conservative: fits v7x 64 MiB / 32 MiB scoped
    cap = max(8, min(1024, (budget // per_row) // 8 * 8))
    if batch < 16:
        return batch                   # single tile; full-dim block is always legal
    # Keep >= 2 grid steps so the "parallel" batch axis can use both v7x TCs.
    return max(8, min(cap, _round_up((batch + 1) // 2, 8)))


@jax.jit
def surface_forward(x, packed):
    """forward(x) for SurfaceModel. x: [B, input_dim] -> [B, 1] (f32)."""
    w1p, b1p, w2p, b2p, w3p, b3p = packed
    B, input_dim = x.shape

    compute_dtype = w1p.dtype          # weights define the MXU operand dtype
    tm = _choose_tm(B, input_dim, x.dtype.itemsize)
    grid = (pl.cdiv(B, tm),)           # ragged last tile handled by Pallas clamping

    kernel = functools.partial(surface_mlp_kernel, compute_dtype=compute_dtype)

    out = pl.pallas_call(
        kernel,
        out_shape=jax.ShapeDtypeStruct((B, 1), jnp.float32),
        grid=grid,
        in_specs=[
            pl.BlockSpec((tm, input_dim), lambda i: (i, 0)),          # activation tile
            pl.BlockSpec((input_dim, HIDDEN1), lambda i: (0, 0)),     # weights resident
            pl.BlockSpec((1, HIDDEN1), lambda i: (0, 0)),
            pl.BlockSpec((HIDDEN1, HIDDEN2_PAD), lambda i: (0, 0)),
            pl.BlockSpec((1, HIDDEN2_PAD), lambda i: (0, 0)),
            pl.BlockSpec((1, HIDDEN2_PAD), lambda i: (0, 0)),
            pl.BlockSpec((1, 1), lambda i: (0, 0)),
        ],
        out_specs=pl.BlockSpec((tm, 1), lambda i: (i, 0)),            # narrow output
        compiler_params=pltpu.CompilerParams(
            dimension_semantics=("parallel",),        # v7x: shard batch over 2 TCs
            vmem_limit_bytes=32 * 1024 * 1024,
        ),
    )(x, w1p, b1p, w2p, b2p, w3p, b3p)

    return out


def surface_ref(x, params):
    """Plain-JAX reference with the exact PyTorch math/layout."""
    w1, b1, w2, b2, w3, b3 = params
    h1 = jnp.maximum(x @ w1.T + b1, 0.0)
    h2 = jnp.maximum(h1 @ w2.T + b2, 0.0)
    return h2 @ w3.T + b3


if __name__ == "__main__":
    input_dim = 16
    key = jax.random.PRNGKey(0)
    kx, kx2, kp = jax.random.split(key, 3)
    params = init_surface_params(kp, input_dim)
    packed_f32 = pack_params(params, dtype=jnp.float32)

    # Small single-tile case.
    x = jax.random.normal(kx, (8, input_dim), jnp.float32)
    ref = surface_ref(x, params)
    out = jax.block_until_ready(surface_forward(x, packed_f32))
    assert out.shape == (8, 1)
    assert jnp.allclose(out, ref, atol=2e-3, rtol=2e-3), \
        float(jnp.max(jnp.abs(out - ref)))

    # Multi-tile case with a ragged last tile (no x padding, no output slicing).
    x2 = jax.random.normal(kx2, (41, input_dim), jnp.float32)
    ref2 = surface_ref(x2, params)
    out2 = jax.block_until_ready(surface_forward(x2, packed_f32))
    assert out2.shape == (41, 1)
    assert jnp.allclose(out2, ref2, atol=2e-3, rtol=2e-3), \
        float(jnp.max(jnp.abs(out2 - ref2)))

    # bf16 activation-stream + bf16 MXU operands, f32 accumulation — loose check.
    packed_bf16 = pack_params(params, dtype=jnp.bfloat16)
    out_bf16 = jax.block_until_ready(
        surface_forward(x.astype(jnp.bfloat16), packed_bf16))
    assert out_bf16.shape == (8, 1)
    assert jnp.allclose(out_bf16, ref, atol=5e-2, rtol=5e-2)

    print("KERNEL_OK")
</pallas_src>

<mosaic_0001>
module attributes {stable_mosaic.version = 11 : i64} {
  func.func @surface_mlp_kernel(%arg0: i32, %arg1: memref<8x16xf32, #tpu.memory_space<vmem>>, %arg2: memref<16x128xf32, #tpu.memory_space<vmem>>, %arg3: memref<1x128xf32, #tpu.memory_space<vmem>>, %arg4: memref<128x128xf32, #tpu.memory_space<vmem>>, %arg5: memref<1x128xf32, #tpu.memory_space<vmem>>, %arg6: memref<1x128xf32, #tpu.memory_space<vmem>>, %arg7: memref<1x1xf32, #tpu.memory_space<vmem>>, %arg8: memref<8x1xf32, #tpu.memory_space<vmem>>) attributes {dimension_semantics = [#tpu.dimension_semantics<parallel>], iteration_bounds = array<i64: 1>, scalar_prefetch = 0 : i64, scratch_operands = 0 : i64, tpu.core_type = #tpu.core_type<tc>, window_params = [{transform_indices = @transform_0, window_bounds = array<i64: 8, 16>}, {pipeline_mode = #tpu.pipeline_mode<synchronous>, transform_indices = @transform_1, window_bounds = array<i64: 16, 128>}, {pipeline_mode = #tpu.pipeline_mode<synchronous>, transform_indices = @transform_2, window_bounds = array<i64: 1, 128>}, {pipeline_mode = #tpu.pipeline_mode<synchronous>, transform_indices = @transform_3, window_bounds = array<i64: 128, 128>}, {pipeline_mode = #tpu.pipeline_mode<synchronous>, transform_indices = @transform_4, window_bounds = array<i64: 1, 128>}, {pipeline_mode = #tpu.pipeline_mode<synchronous>, transform_indices = @transform_5, window_bounds = array<i64: 1, 128>}, {pipeline_mode = #tpu.pipeline_mode<synchronous>, transform_indices = @transform_6, window_bounds = array<i64: 1, 1>}, {transform_indices = @transform_7, window_bounds = array<i64: 8, 1>}]} {
    %c0 = arith.constant 0 : index
    %c0_0 = arith.constant 0 : index
    %0 = vector.load %arg1[%c0, %c0_0] : memref<8x16xf32, #tpu.memory_space<vmem>>, vector<8x16xf32>
    %c0_1 = arith.constant 0 : index
    %c0_2 = arith.constant 0 : index
    %1 = vector.load %arg2[%c0_1, %c0_2] : memref<16x128xf32, #tpu.memory_space<vmem>>, vector<16x128xf32>
    %cst = arith.constant dense<0.000000e+00> : vector<8x128xf32>
    %2 = tpu.matmul %0, %1, %cst {dimension_numbers = #tpu.dot_dimension_numbers<[1], [0], [0], [1], [0, 0, 1, 1], [], []>} : vector<8x16xf32>, vector<16x128xf32>, vector<8x128xf32> -> vector<8x128xf32>
    %c0_3 = arith.constant 0 : index
    %c0_4 = arith.constant 0 : index
    %3 = vector.load %arg3[%c0_3, %c0_4] : memref<1x128xf32, #tpu.memory_space<vmem>>, vector<1x128xf32>
    %4 = vector.broadcast %3 : vector<1x128xf32> to vector<8x128xf32>
    %5 = arith.addf %2, %4 : vector<8x128xf32>
    %cst_5 = arith.constant 0.000000e+00 : f32
    %6 = vector.broadcast %cst_5 : f32 to vector<8x128xf32>
    %7 = arith.maximumf %5, %6 : vector<8x128xf32>
    %c0_6 = arith.constant 0 : index
    %c0_7 = arith.constant 0 : index
    %8 = vector.load %arg4[%c0_6, %c0_7] : memref<128x128xf32, #tpu.memory_space<vmem>>, vector<128x128xf32>
    %cst_8 = arith.constant dense<0.000000e+00> : vector<8x128xf32>
    %9 = tpu.matmul %7, %8, %cst_8 {dimension_numbers = #tpu.dot_dimension_numbers<[1], [0], [0], [1], [0, 0, 1, 1], [], []>} : vector<8x128xf32>, vector<128x128xf32>, vector<8x128xf32> -> vector<8x128xf32>
    %c0_9 = arith.constant 0 : index
    %c0_10 = arith.constant 0 : index
    %10 = vector.load %arg5[%c0_9, %c0_10] : memref<1x128xf32, #tpu.memory_space<vmem>>, vector<1x128xf32>
    %11 = vector.broadcast %10 : vector<1x128xf32> to vector<8x128xf32>
    %12 = arith.addf %9, %11 : vector<8x128xf32>
    %cst_11 = arith.constant 0.000000e+00 : f32
    %13 = vector.broadcast %cst_11 : f32 to vector<8x128xf32>
    %14 = arith.maximumf %12, %13 : vector<8x128xf32>
    %c0_12 = arith.constant 0 : index
    %c0_13 = arith.constant 0 : index
    %15 = vector.load %arg6[%c0_12, %c0_13] : memref<1x128xf32, #tpu.memory_space<vmem>>, vector<1x128xf32>
    %16 = vector.broadcast %15 : vector<1x128xf32> to vector<8x128xf32>
    %17 = arith.mulf %14, %16 : vector<8x128xf32>
    %cst_14 = arith.constant dense<0.000000e+00> : vector<8xf32>
    %18 = vector.multi_reduction <add>, %17, %cst_14 [1] : vector<8x128xf32> to vector<8xf32>
    %19 = vector.shape_cast %18 : vector<8xf32> to vector<8x1xf32>
    %c0_15 = arith.constant 0 : index
    %c0_16 = arith.constant 0 : index
    %20 = vector.load %arg7[%c0_15, %c0_16] : memref<1x1xf32, #tpu.memory_space<vmem>>, vector<1x1xf32>
    %21 = vector.broadcast %20 : vector<1x1xf32> to vector<8x1xf32>
    %22 = arith.addf %19, %21 : vector<8x1xf32>
    %c0_17 = arith.constant 0 : index
    %c0_18 = arith.constant 0 : index
    %23 = vector.load %arg8[%c0_17, %c0_18] : memref<8x1xf32, #tpu.memory_space<vmem>>, vector<8x1xf32>
    tpu.vector_store %arg8[%c0_17, %c0_18], %22 {strides = array<i32>} : memref<8x1xf32, #tpu.memory_space<vmem>>, vector<8x1xf32>,
    return
  }
  func.func @transform_0(%arg0: i32) -> (i32, i32) {
    %c0_i32 = arith.constant 0 : i32
    %c0_i32_0 = arith.constant 0 : i32
    return %arg0, %c0_i32 : i32, i32
  }
  func.func @transform_1(%arg0: i32) -> (i32, i32) {
    %c0_i32 = arith.constant 0 : i32
    %c0_i32_0 = arith.constant 0 : i32
    %c0_i32_1 = arith.constant 0 : i32
    return %c0_i32, %c0_i32_0 : i32, i32
  }
  func.func @transform_2(%arg0: i32) -> (i32, i32) {
    %c0_i32 = arith.constant 0 : i32
    %c0_i32_0 = arith.constant 0 : i32
    %c0_i32_1 = arith.constant 0 : i32
    return %c0_i32, %c0_i32_0 : i32, i32
  }
  func.func @transform_3(%arg0: i32) -> (i32, i32) {
    %c0_i32 = arith.constant 0 : i32
    %c0_i32_0 = arith.constant 0 : i32
    %c0_i32_1 = arith.constant 0 : i32
    return %c0_i32, %c0_i32_0 : i32, i32
  }
  func.func @transform_4(%arg0: i32) -> (i32, i32) {
    %c0_i32 = arith.constant 0 : i32
    %c0_i32_0 = arith.constant 0 : i32
    %c0_i32_1 = arith.constant 0 : i32
    return %c0_i32, %c0_i32_0 : i32, i32
  }
  func.func @transform_5(%arg0: i32) -> (i32, i32) {
    %c0_i32 = arith.constant 0 : i32
    %c0_i32_0 = arith.constant 0 : i32
    %c0_i32_1 = arith.constant 0 : i32
    return %c0_i32, %c0_i32_0 : i32, i32
  }
  func.func @transform_6(%arg0: i32) -> (i32, i32) {
    %c0_i32 = arith.constant 0 : i32
    %c0_i32_0 = arith.constant 0 : i32
    %c0_i32_1 = arith.constant 0 : i32
    return %c0_i32, %c0_i32_0 : i32, i32
  }
  func.func @transform_7(%arg0: i32) -> (i32, i32) {
    %c0_i32 = arith.constant 0 : i32
    %c0_i32_0 = arith.constant 0 : i32
    return %arg0, %c0_i32 : i32, i32
  }
}

</mosaic_0001>

<bundles_post_ra>
// kernel: surface_forward.1
= control target key start
LH: loop header
LB: loop body
LE: loop exit
PB: predicated region body
PF: predicated region fallthrough
CT: control target
= control target key end

     0   :  { %s321_s0 = inlined_call_operand.hbm [shape: f32[8,16], index: 0, kind: input, shape index: {}]   ;;  %s322_s1 = inlined_call_operand.hbm [shape: f32[16,128], index: 1, kind: input, shape index: {}]   ;;  %s323_s2 = inlined_call_operand.vmem [shape: f32[1,128], index: 2, kind: input, shape index: {}]   ;;  %s324_s3 = inlined_call_operand.hbm [shape: f32[128,128], index: 3, kind: input, shape index: {}]   ;;  %s325_s4 = inlined_call_operand.vmem [shape: f32[1,128], index: 4, kind: input, shape index: {}]   ;;  %s326_s5 = inlined_call_operand.vmem [shape: f32[1,128], index: 5, kind: input, shape index: {}]   ;;  %s327_s6 = inlined_call_operand.<no memory space> [shape: f32[1,1], index: 6, kind: input, shape index: {}]   ;;  %s328_s7 = inlined_call_operand.vmem [shape: f32[8,1], index: 7, kind: output, shape index: {}]  }
   0x1   :  { %v12_v0 = vstv %s327_s6 }
   0x2   :  { %13 = vst [vmem:[#allocation2] sm:$0x1] %v12_v0 }
   0x3   :  { %14 = vsyncpa [#allocation4], 0 }
   0x4   :  { %15 = vsyncpa [#allocation6], 0  ;;  %s31_s28 = sshll.u32 %s322_s1, 4  ;;  %s252_s29 = smov [#allocation5]   ;;  %s32_s28 = int_to_ptr.hbm [resolvable:$true] %s31_s28 }
   0x5   :  { %s33_s30 = sshll.u32 %s252_s29, 4  ;;  %s21_s10 = sshll.u32 %s321_s0, 4  ;;  %s34_s30 = int_to_ptr.vmem [resolvable:$true] %s33_s30  ;;  %s22_s10 = int_to_ptr.hbm [resolvable:$true] %s21_s10 }
   0x6   :  { %s253_s11 = smov 128   ;;  %s254_s12 = smov 8  }
   0x7   :  { %39 = dma.hbm_to_vmem [thread:$0]  %s32_s28, 256, %s34_s30, [#allocation6], %s253_s11, %s253_s11, %s254_s12  }
   0x8   :  { %s255_s6 = smov [#allocation3]   ;;  %s46_s16 = sshll.u32 %s324_s3, 4  ;;  %s47_s16 = int_to_ptr.hbm [resolvable:$true] %s46_s16 }
   0x9   :  { %s23_s13 = sshll.u32 %s255_s6, 4  ;;  %s256_s1 = smov [#allocation7]   ;;  %s24_s13 = int_to_ptr.vmem [resolvable:$true] %s23_s13 }
   0xa   :  { %26 = dma.hbm_to_vmem [thread:$0]  %s22_s10, 128, %s24_s13, [#allocation4]  }
   0xb   :  { %s48_s17 = sshll.u32 %s256_s1, 4  ;;  %s49_s17 = int_to_ptr.vmem [resolvable:$true] %s48_s17 }
   0xc   :  { %54 = dma.hbm_to_vmem [thread:$0]  %s47_s16, 2048, %s49_s17, [#allocation6], %s253_s11, %s253_s11, %s254_s12  }
   0xd   :  { %248 = dma.done.wait [#allocation4], 128  }
   0xe   :  { %249 = vsyncadd [#allocation4], 4294967168 }
   0xf   :  { %250 = dma.done.wait [#allocation6], 2304  }
  0x10   :  { %251 = vsyncadd [#allocation6], 4294964992  ;;  %v75_v1 = vld [vmem:[#allocation5 + $0x8] sm:$0xff]  ;;  %v74_v2 = vld [vmem:[#allocation5] sm:$0xff]  ;;  %vm80_vm0 = vcmask 130048   ;;  %vm158_vm1 = vcmask 7168  }
  0x11   :  { %98 = vmatpush.msra.mxu0 %v75_v1  ;;  %v73_v3 = vld [vmem:[#allocation3] sm:$0xff]  ;;  %v120_v4 = vld [vmem:[#allocation7 + $0x78] sm:$0xff]  ;;  %v119_v5 = vld [vmem:[#allocation7 + $0x70] sm:$0xff] }
  0x12   :  { %125 = vmatpush.msra.mxu1 %v120_v4  ;;  %v118_v6 = vld [vmem:[#allocation7 + $0x68] sm:$0xff]  ;;  %v117_v7 = vld [vmem:[#allocation7 + $0x60] sm:$0xff]  ;;  %v116_v8 = vld [vmem:[#allocation7 + $0x58] sm:$0xff] }
  0x13   :  { %99 = vmatpush.msra.mxu0 %v74_v2  ;;  %v115_v9 = vld [vmem:[#allocation7 + $0x50] sm:$0xff]  ;;  %v114_v10 = vld [vmem:[#allocation7 + $0x48] sm:$0xff]  ;;  %v113_v11 = vld [vmem:[#allocation7 + $0x40] sm:$0xff] }
  0x14   :  { %166 = vmatmul.msk.f32.vlgmr.msra.gmra.mxu0 %vm80_vm0, %v73_v3  ;;  %126 = vmatpush.msra.mxu1 %v119_v5  ;;  %v112_v12 = vld [vmem:[#allocation7 + $0x38] sm:$0xff]  ;;  %v111_v13 = vld [vmem:[#allocation7 + $0x30] sm:$0xff]  ;;  %v110_v14 = vld [vmem:[#allocation7 + $0x28] sm:$0xff] }
  0x15   :  { %v109_v15 = vld [vmem:[#allocation7 + $0x20] sm:$0xff]  ;;  %v108_v16 = vld [vmem:[#allocation7 + $0x18] sm:$0xff]  ;;  %v107_v17 = vld [vmem:[#allocation7 + $0x10] sm:$0xff] }
  0x16   :  { %127 = vmatpush.msra.mxu1 %v118_v6  ;;  %v106_v18 = vld [vmem:[#allocation7 + $0x8] sm:$0xff]  ;;  %v105_v19 = vld [vmem:[#allocation7] sm:$0xff] }
  0x17   :  { %v172_v20 = vld [vmem:[%s323_s2] ss:$0 sm:$0xff] }
  0x18   :  { %128 = vmatpush.msra.mxu1 %v117_v7  ;;  %v173_v24 = vld [vmem:[%s325_s4] ss:$0 sm:$0xff] }
  0x19   :  { %v174_v27 = vld [vmem:[%s326_s5] ss:$0 sm:$0xff] }
  0x1a   :  { %129 = vmatpush.msra.mxu1 %v116_v8  ;;  %v175_v30 = vld [vmem:[#allocation2] ss:$0 sm:$0xff] }
  0x1c   :  { %130 = vmatpush.msra.mxu1 %v115_v9 }
  0x1e   :  { %131 = vmatpush.msra.mxu1 %v114_v10 }
  0x20   :  { %132 = vmatpush.msra.mxu1 %v113_v11 }
  0x22   :  { %133 = vmatpush.msra.mxu1 %v112_v12 }
  0x24   :  { %134 = vmatpush.msra.mxu1 %v111_v13 }
  0x26   :  { %135 = vmatpush.msra.mxu1 %v110_v14 }
  0x28   :  { %136 = vmatpush.msra.mxu1 %v109_v15 }
  0x2a   :  { %137 = vmatpush.msra.mxu1 %v108_v16 }
  0x2c   :  { %138 = vmatpush.msra.mxu1 %v107_v17 }
  0x2e   :  { %139 = vmatpush.msra.mxu1 %v106_v18 }
  0x30   :  { %140 = vmatpush.msra.mxu1 %v105_v19 }
  0x91   :  { %v101_v21 = vpop.f32.mrf.mxu0 }
  0x92   :  { %v102_v22 = vadd.f32 %v172_v20, %v101_v21 }
  0x94   :  { %v104_v23 = vmax.f32 %v102_v22, 0.0 }
  0x96   :  { %141 = vmatmul.f32.vlgmr.msra.gmra.mxu1 %v104_v23 }
 0x113   :  { %v142_v25 = vpop.f32.mrf.mxu1 }
 0x114   :  { %v143_v26 = vadd.f32 %v173_v24, %v142_v25 }
 0x116   :  { %v145_v28 = vmax.f32 %v143_v26, 0.0 }
 0x118   :  { %v150_v29 = vmul.f32 %v174_v27, %v145_v28 }
 0x11a   :  { %151 = vadd.xlane.f32.xlu0 %v150_v29 }
 0x18d   :  { %v152_v31 = vpop.xlane.xlu0 %151 }
 0x18e   :  { %v157_v32 = vadd.f32 %v175_v30, %v152_v31 }
 0x190   :  { %159 = vst.msk [vmem:[%s328_s7] sm:$0xff] %vm158_vm1, %v157_v32 }
 0x191   :  { %164 = vsyncpa [#allocation4], 1 }
 0x192   :  { %165 = vsyncpa [#allocation6], 1 }

</bundles_post_ra>
